<compile_context>
chip_gen: v5e
topology: v5e:2x2
jax: 0.10.0
libtpu: 0.0.40
codegen_flags: <defaults>
</compile_context>

<pallas_src>
import functools

import jax
import jax.numpy as jnp
from jax.experimental import pallas as pl
from jax.experimental.pallas import tpu as pltpu


def _round_up(v, m):
    return (v + m - 1) // m * m


def _pad2d(a, rows, cols):
    return jnp.pad(a, ((0, rows - a.shape[0]), (0, cols - a.shape[1])))


def _gcn_layer_kernel(adj_ref, x_ref, w_ref, o_ref, acc_ref, *, apply_relu, agg_first):
    """One grid step of out = [relu](adj @ x @ w), reduction over grid axis 1.

    agg_first=True : accumulate (adj @ x) tiles, apply the small W matmul at
                     the last reduction step (best when F_in <= F_out).
    agg_first=False: per step compute h = x_tile @ W, accumulate adj @ h
                     (best when F_out < F_in).
    """
    k = pl.program_id(1)
    nk = pl.num_programs(1)

    @pl.when(k == 0)
    def _():
        acc_ref[...] = jnp.zeros_like(acc_ref)

    if agg_first:
        acc_ref[...] += jnp.dot(
            adj_ref[...], x_ref[...], preferred_element_type=jnp.float32
        )
    else:
        h = jnp.dot(x_ref[...], w_ref[...], preferred_element_type=jnp.float32)
        acc_ref[...] += jnp.dot(
            adj_ref[...], h.astype(adj_ref.dtype), preferred_element_type=jnp.float32
        )

    @pl.when(k == nk - 1)
    def _():
        if agg_first:
            y = jnp.dot(
                acc_ref[...].astype(w_ref.dtype),
                w_ref[...],
                preferred_element_type=jnp.float32,
            )
        else:
            y = acc_ref[...]
        if apply_relu:
            y = jnp.maximum(y, 0.0)
        o_ref[...] = y.astype(o_ref.dtype)


def gcn_layer(adj, x, w, *, apply_relu, agg_first, tm, tk):
    """One GCN layer on padded operands.

    adj: (Np, Np), x: (Np, F_in_pad), w: (F_in_pad, F_out_pad) — all dims are
    multiples of the tile / 128-lane requirements.
    """
    n_pad = adj.shape[0]
    f_in_pad, f_out_pad = w.shape
    f_mid = f_in_pad if agg_first else f_out_pad

    grid = (n_pad // tm, n_pad // tk)
    kernel = functools.partial(
        _gcn_layer_kernel, apply_relu=apply_relu, agg_first=agg_first
    )

    itemsize = jnp.dtype(x.dtype).itemsize
    flops = 2 * n_pad * n_pad * f_mid + 2 * n_pad * f_in_pad * f_out_pad
    bytes_accessed = (
        adj.size * itemsize
        + x.size * itemsize
        + w.size * itemsize
        + n_pad * f_out_pad * itemsize
    )

    return pl.pallas_call(
        kernel,
        out_shape=jax.ShapeDtypeStruct((n_pad, f_out_pad), x.dtype),
        grid_spec=pltpu.PrefetchScalarGridSpec(
            num_scalar_prefetch=0,
            grid=grid,
            in_specs=[
                pl.BlockSpec((tm, tk), lambda i, k: (i, k)),        # adj tile
                pl.BlockSpec((tk, f_in_pad), lambda i, k: (k, 0)),  # x rows
                pl.BlockSpec((f_in_pad, f_out_pad), lambda i, k: (0, 0)),  # W resident
            ],
            out_specs=pl.BlockSpec((tm, f_out_pad), lambda i, k: (i, 0)),
            scratch_shapes=[pltpu.VMEM((tm, f_mid), jnp.float32)],
        ),
        compiler_params=pltpu.CompilerParams(
            # node-row tiles independent (megacore-shardable); k is the reduction
            dimension_semantics=("parallel", "arbitrary"),
            vmem_limit_bytes=32 * 1024 * 1024,
        ),
        cost_estimate=pl.CostEstimate(
            flops=flops, transcendentals=0, bytes_accessed=bytes_accessed
        ),
    )(adj, x, w)


def gcn_forward(x, adjacency_hat, weights, *, compute_dtype=jnp.float32, tile=512):
    """Replicates GCN.forward.

    weights: list of (out_features, in_features) matrices (PyTorch Linear layout).
    dropout p=0.0 -> identity, so it is omitted.
    compute_dtype: jnp.float32 or jnp.bfloat16 (bf16 halves HBM traffic and
                   doubles MXU rate on v6e/v7x; accumulation stays f32).
    tile: adjacency tile edge (multiple of 128); 512 keeps the double-buffered
          f32 adj stream at ~2 MiB, safely inside v5e's 16 MiB / v7x's 32 MiB
          scoped VMEM defaults.
    """
    n, f_in = x.shape
    out_features = weights[-1].shape[0]

    n_lane = _round_up(n, 128)
    tm = min(tile, n_lane)           # tile is a multiple of 128, so tm is too
    n_pad = _round_up(n, tm)

    # Zero-pad node and feature dims (exact: padded rows/cols contribute 0).
    adj_p = _pad2d(adjacency_hat, n_pad, n_pad).astype(compute_dtype)
    h = _pad2d(x, n_pad, _round_up(f_in, 128)).astype(compute_dtype)

    # Pre-transpose weights once (PyTorch (F_out, F_in) -> (F_in, F_out)) and
    # pad both dims to 128 lanes so the kernel never transposes on-chip and
    # every store is lane-dense.
    w_pads, agg_firsts = [], []
    for w in weights:
        wt = w.T
        w_pads.append(
            _pad2d(wt, _round_up(wt.shape[0], 128), _round_up(wt.shape[1], 128)).astype(
                compute_dtype
            )
        )
        # pick matmul order so the N^2 contraction width is min(F_in, F_out)
        agg_firsts.append(w.shape[1] <= w.shape[0])

    num_layers = len(weights)
    for i, (wp, agg_first) in enumerate(zip(w_pads, agg_firsts)):
        h = gcn_layer(
            adj_p,
            h,
            wp,
            apply_relu=(i < num_layers - 1),
            agg_first=agg_first,
            tm=tm,
            tk=tm,
        )
    return h[:n, :out_features].astype(x.dtype)


def init_gcn_params(key, input_size, hidden_size, output_size, num_hidden):
    """Deterministic init matching nn.Linear default: U(-1/sqrt(fan_in), 1/sqrt(fan_in))."""
    sizes = [(hidden_size, input_size)]
    for _ in range(1, num_hidden - 1):
        sizes.append((hidden_size, hidden_size))
    sizes.append((output_size, hidden_size))
    weights = []
    for shape in sizes:
        key, sub = jax.random.split(key)
        bound = 1.0 / jnp.sqrt(shape[1])
        weights.append(
            jax.random.uniform(sub, shape, dtype=jnp.float32, minval=-bound, maxval=bound)
        )
    return weights


def make_normalized_adjacency(key, n):
    """Dense symmetric normalized adjacency with self loops: D^-1/2 (A+I) D^-1/2."""
    a = (jax.random.uniform(key, (n, n)) > 0.7).astype(jnp.float32)
    a = jnp.maximum(a, a.T)  # symmetric
    a = a + jnp.eye(n, dtype=jnp.float32)
    a = jnp.minimum(a, 1.0)
    deg = jnp.sum(a, axis=1)
    d_inv_sqrt = 1.0 / jnp.sqrt(deg)
    return a * d_inv_sqrt[:, None] * d_inv_sqrt[None, :]


if __name__ == "__main__":
    # Small shapes consistent with the module's forward:
    #   x: (num_nodes, input_size), adjacency_hat: (num_nodes, num_nodes)
    num_nodes = 200   # pads to 256 -> with tile=128 the grid is (2, 2)
    input_size = 8
    hidden_size = 32
    output_size = 4
    num_hidden = 3    # 3 linear layers total (2 hidden blocks + final)

    key = jax.random.PRNGKey(0)
    k_x, k_adj, k_w = jax.random.split(key, 3)

    x = jax.random.normal(k_x, (num_nodes, input_size), dtype=jnp.float32)
    adjacency_hat = make_normalized_adjacency(k_adj, num_nodes)
    weights = init_gcn_params(k_w, input_size, hidden_size, output_size, num_hidden)

    # f32 compute path (tile=128 to exercise the multi-tile accumulator path).
    out = gcn_forward(x, adjacency_hat, weights, compute_dtype=jnp.float32, tile=128)
    out = jax.block_until_ready(out)

    # Reference check in plain JAX (same math) to ensure kernel correctness.
    ref = x
    for i in range(num_hidden - 1):
        ref = jnp.maximum(adjacency_hat @ (ref @ weights[i].T), 0.0)
    ref = adjacency_hat @ (ref @ weights[-1].T)
    assert out.shape == (num_nodes, output_size)
    assert jnp.allclose(out, ref, atol=1e-4, rtol=1e-4)

    # bf16 compute path (halved HBM traffic / 2x MXU rate on v6e/v7x),
    # f32 accumulation inside the kernel; loose tolerance for bf16 rounding.
    out_bf16 = gcn_forward(
        x, adjacency_hat, weights, compute_dtype=jnp.bfloat16, tile=128
    )
    out_bf16 = jax.block_until_ready(out_bf16)
    assert jnp.allclose(out_bf16, ref, atol=1e-1, rtol=1e-1)

    print("KERNEL_OK")
</pallas_src>

<mosaic_0001>
module attributes {stable_mosaic.version = 11 : i64} {
  func.func @_gcn_layer_kernel(%arg0: i32, %arg1: i32, %arg2: memref<128x128xf32, #tpu.memory_space<vmem>>, %arg3: memref<128x128xf32, #tpu.memory_space<vmem>>, %arg4: memref<128x128xf32, #tpu.memory_space<vmem>>, %arg5: memref<128x128xf32, #tpu.memory_space<vmem>>, %arg6: memref<128x128xf32, #tpu.memory_space<vmem>>) attributes {dimension_semantics = [#tpu.dimension_semantics<parallel>, #tpu.dimension_semantics<arbitrary>], iteration_bounds = array<i64: 2, 2>, scalar_prefetch = 0 : i64, scratch_operands = 1 : i64, tpu.core_type = #tpu.core_type<tc>, window_params = [{transform_indices = @transform_0, window_bounds = array<i64: 128, 128>}, {transform_indices = @transform_1, window_bounds = array<i64: 128, 128>}, {pipeline_mode = #tpu.pipeline_mode<synchronous>, transform_indices = @transform_2, window_bounds = array<i64: 128, 128>}, {transform_indices = @transform_3, window_bounds = array<i64: 128, 128>}]} {
    %c0_i32 = arith.constant 0 : i32
    %0 = arith.cmpi eq, %arg1, %c0_i32 : i32
    %1 = arith.extui %0 : i1 to i32
    %c0_i32_0 = arith.constant 0 : i32
    %2 = arith.cmpi ne, %1, %c0_i32_0 : i32
    scf.if %2 {
      %cst_9 = arith.constant 0.000000e+00 : f32
      %12 = vector.broadcast %cst_9 : f32 to vector<128x128xf32>
      %c0_10 = arith.constant 0 : index
      %c0_11 = arith.constant 0 : index
      %13 = vector.load %arg6[%c0_10, %c0_11] : memref<128x128xf32, #tpu.memory_space<vmem>>, vector<128x128xf32>
      tpu.vector_store %arg6[%c0_10, %c0_11], %12 {strides = array<i32>} : memref<128x128xf32, #tpu.memory_space<vmem>>, vector<128x128xf32>,
    } else {
    }
    %c0 = arith.constant 0 : index
    %c0_1 = arith.constant 0 : index
    %3 = vector.load %arg6[%c0, %c0_1] : memref<128x128xf32, #tpu.memory_space<vmem>>, vector<128x128xf32>
    %c0_2 = arith.constant 0 : index
    %c0_3 = arith.constant 0 : index
    %4 = vector.load %arg2[%c0_2, %c0_3] : memref<128x128xf32, #tpu.memory_space<vmem>>, vector<128x128xf32>
    %c0_4 = arith.constant 0 : index
    %c0_5 = arith.constant 0 : index
    %5 = vector.load %arg3[%c0_4, %c0_5] : memref<128x128xf32, #tpu.memory_space<vmem>>, vector<128x128xf32>
    %cst = arith.constant dense<0.000000e+00> : vector<128x128xf32>
    %6 = tpu.matmul %4, %5, %cst {dimension_numbers = #tpu.dot_dimension_numbers<[1], [0], [0], [1], [0, 0, 1, 1], [], []>} : vector<128x128xf32>, vector<128x128xf32>, vector<128x128xf32> -> vector<128x128xf32>
    %7 = arith.addf %3, %6 : vector<128x128xf32>
    %c0_6 = arith.constant 0 : index
    %c0_7 = arith.constant 0 : index
    %8 = vector.load %arg6[%c0_6, %c0_7] : memref<128x128xf32, #tpu.memory_space<vmem>>, vector<128x128xf32>
    tpu.vector_store %arg6[%c0_6, %c0_7], %7 {strides = array<i32>} : memref<128x128xf32, #tpu.memory_space<vmem>>, vector<128x128xf32>,
    %c1_i32 = arith.constant 1 : i32
    %9 = arith.cmpi eq, %arg1, %c1_i32 : i32
    %10 = arith.extui %9 : i1 to i32
    %c0_i32_8 = arith.constant 0 : i32
    %11 = arith.cmpi ne, %10, %c0_i32_8 : i32
    scf.if %11 {
      %c0_9 = arith.constant 0 : index
      %c0_10 = arith.constant 0 : index
      %12 = vector.load %arg6[%c0_9, %c0_10] : memref<128x128xf32, #tpu.memory_space<vmem>>, vector<128x128xf32>
      %c0_11 = arith.constant 0 : index
      %c0_12 = arith.constant 0 : index
      %13 = vector.load %arg4[%c0_11, %c0_12] : memref<128x128xf32, #tpu.memory_space<vmem>>, vector<128x128xf32>
      %cst_13 = arith.constant dense<0.000000e+00> : vector<128x128xf32>
      %14 = tpu.matmul %12, %13, %cst_13 {dimension_numbers = #tpu.dot_dimension_numbers<[1], [0], [0], [1], [0, 0, 1, 1], [], []>} : vector<128x128xf32>, vector<128x128xf32>, vector<128x128xf32> -> vector<128x128xf32>
      %cst_14 = arith.constant 0.000000e+00 : f32
      %15 = vector.broadcast %cst_14 : f32 to vector<128x128xf32>
      %16 = arith.maximumf %14, %15 : vector<128x128xf32>
      %c0_15 = arith.constant 0 : index
      %c0_16 = arith.constant 0 : index
      %17 = vector.load %arg5[%c0_15, %c0_16] : memref<128x128xf32, #tpu.memory_space<vmem>>, vector<128x128xf32>
      tpu.vector_store %arg5[%c0_15, %c0_16], %16 {strides = array<i32>} : memref<128x128xf32, #tpu.memory_space<vmem>>, vector<128x128xf32>,
    } else {
    }
    return
  }
  func.func @transform_0(%arg0: i32, %arg1: i32) -> (i32, i32) {
    %c0_i32 = arith.constant 0 : i32
    return %arg0, %arg1 : i32, i32
  }
  func.func @transform_1(%arg0: i32, %arg1: i32) -> (i32, i32) {
    %c0_i32 = arith.constant 0 : i32
    %c0_i32_0 = arith.constant 0 : i32
    return %arg1, %c0_i32 : i32, i32
  }
  func.func @transform_2(%arg0: i32, %arg1: i32) -> (i32, i32) {
    %c0_i32 = arith.constant 0 : i32
    %c0_i32_0 = arith.constant 0 : i32
    %c0_i32_1 = arith.constant 0 : i32
    return %c0_i32, %c0_i32_0 : i32, i32
  }
  func.func @transform_3(%arg0: i32, %arg1: i32) -> (i32, i32) {
    %c0_i32 = arith.constant 0 : i32
    %c0_i32_0 = arith.constant 0 : i32
    return %arg0, %c0_i32 : i32, i32
  }
}

</mosaic_0001>

<bundles_post_ra>
// kernel: tpu_custom_call.1
= control target key start
LH: loop header
LB: loop body
LE: loop exit
PB: predicated region body
PF: predicated region fallthrough
CT: control target
= control target key end

     0   :  { %s1569_s0 = inlined_call_operand.hbm [shape: f32[256,256], index: 0, kind: input, shape index: {}]   ;;  %s1570_s1 = inlined_call_operand.hbm [shape: f32[256,128], index: 1, kind: input, shape index: {}]   ;;  %s1571_s2 = inlined_call_operand.hbm [shape: f32[128,128], index: 2, kind: input, shape index: {}]   ;;  %s1572_s3 = inlined_call_operand.hbm [shape: f32[256,128], index: 3, kind: output, shape index: {}]  }
   0x1   :  { %1587 = sst [smem:[#allocation25_spill]] %s1569_s0 }
   0x2   :  { %1588 = sst [smem:[#allocation26_spill]] %s1571_s2 }
   0x3   :  { %1589 = sst [smem:[#allocation27_spill]] %s1572_s3 }
   0x4   :  { %8 = vsyncpa [#allocation4], 0 }
   0x5   :  { %10 = vsyncpa [#allocation4 + $0x1], 0 }
   0x6   :  { %11 = vsyncpa [#allocation7], 0 }
   0x7   :  { %13 = vsyncpa [#allocation7 + $0x1], 0 }
   0x8   :  { %14 = vsyncpa [#allocation5], 0 }
   0x9   :  { %16 = vsyncpa [#allocation5 + $0x1], 0  ;;  %s1244_s12 = smov 0   ;;  %s1246_s13 = smov 0  }
   0xa   :  { %s1248_s14 = smov 0   ;;  %s1250_s15 = smov 0  }
   0xb   :  { %s1252_s16 = smov 0   ;;  %s1254_s17 = smov 0  }
   0xc   :  { %s1256_s18 = smov 0   ;;  %s1258_s19 = smov 0  }
   0xd   :  { %s1260_s20 = smov 0   ;;  %s1262_s21 = smov 0  }
   0xe   :  { %s1264_s22 = smov 0   ;;  %s1266_s23 = smov 0  }
   0xf   :  { %s1268_s24 = smov 0   ;;  %s1270_s25 = smov 0  }
  0x10 LB: > { %1590 = sst [smem:[#allocation14_spill]] %s1163_s12  ;;  %s1311_s26 = sadd.s32 4294967295, %s1215_s25   ;;  %s1215_s25 = sphi %s1270_s25, %s22_s25   ;;  %s1211_s24 = sphi %s1268_s24, %s1635_s24   ;;  %s1207_s23 = sphi %s1266_s23, %s1634_s23   ;;  %s1203_s22 = sphi %s1264_s22, %s1633_s22   ;;  %s1199_s21 = sphi %s1262_s21, %s1632_s21   ;;  %s1195_s20 = sphi %s1260_s20, %s1621_s20   ;;  %s1191_s19 = sphi %s1258_s19, %s1631_s19   ;;  %s1187_s18 = sphi %s1256_s18, %s1630_s18   ;;  %s1183_s17 = sphi %s1254_s17, %s1629_s17   ;;  %s1179_s16 = sphi %s1252_s16, %s1628_s16   ;;  %s1175_s15 = sphi %s1250_s15, %s1627_s15   ;;  %s1171_s14 = sphi %s1248_s14, %s1619_s14   ;;  %s1167_s13 = sphi %s1246_s13, %s1626_s13   ;;  %s1163_s12 = sphi %s1244_s12, %s1625_s12  }
  0x11   : > { %1591 = sst [smem:[#allocation15_spill]] %s1171_s14  ;;  %s701_s27 = sadd.s32 4294967294, %s1215_s25  }
  0x12   : > { %1592 = sst [smem:[#allocation16_spill]] %s1195_s20  ;;  %p56_p0 = scmp.ne.s32.totalorder %s1191_s19, %s1187_s18 }
  0x13   : > { %1593 = sst [smem:[#allocation17_spill]] %s1203_s22  ;;  %p57_p1 = scmp.eq.s32.totalorder %s1311_s26, 0 }
  0x14   : > { %1594 = sst [smem:[#allocation18_spill]] %s1211_s24  ;;  %p82_p2 = scmp.ne.s32.totalorder %s1179_s16, %s1175_s15 }
  0x15   : > { %p126_p3 = scmp.ne.s32.totalorder %s1171_s14, %s1167_s13  ;;  %p1321_p4 = por %p57_p1, %p56_p0 }
  0x16   : > { %p127_p5 = scmp.eq.s32.totalorder %s1311_s26, 3  ;;  %p1328_p6 = por %p82_p2, %p57_p1 }
  0x17   : > { %p132_p7 = scmp.ne.s32.totalorder %s1167_s13, %s1163_s12  ;;  %p133_p9 = scmp.eq.s32.totalorder %s701_s27, 3 }
  0x18   : > { %p1334_p8 = por %p127_p5, %p126_p3  ;;  %p702_p10 = scmp.ge.s32.totalorder %s1215_s25, 1 }
  0x19   : > { %p140_p11 = scmp.lt.s32.totalorder %s1215_s25, 5  ;;  %p1340_p12 = por %p133_p9, %p132_p7 }
  0x1a   : > { %s1597_s30 = scalar_select %p1334_p8, 1, 0 }
  0x1b   : > { %s1599_s4 = scalar_select %p1340_p12, 1, 0 }
  0x1c   : > { %1598 = sst [smem:[#allocation19_spill]] %s1597_s30  ;;  %p1344_p13 = pnand %p702_p10, %p140_p11 }
  0x1d   : > { %1600 = sst [smem:[#allocation20_spill]] %s1599_s4  ;;  %s1217_s9 = smov [#allocation8]  }
  0x1e   : > { %s1602_s2 = sld [smem:[#allocation26_spill]]  ;;  %p833_p0 = pneg %p1344_p13 }
  0x1f   : > { %s153_s10 = sshll.u32 %s1217_s9, 4  ;;  %s1573_s11 = smov 128   ;;  %s154_s10 = int_to_ptr.vmem [resolvable:$true] %s153_s10 }
  0x20   : > { %p834_p2 = pnand %p833_p0, %p57_p1  ;;  %s1575_s15 = smov 8  }
  0x21   : > { %s31_s18 = sadd.s32 1, %s1207_s23  ;;  %s34_s27 = sadd.s32 1, %s1211_s24 }
  0x22   : > { %p32_p3 = scmp.ge.s32.totalorder %s31_s18, 2  ;;  %s43_s6 = sadd.s32 1, %s1195_s20 }
  0x23   : > { %p50_p5 = scmp.ne.s32.totalorder %s1195_s20, %s1191_s19  ;;  %p51_p7 = scmp.eq.s32.totalorder %s1215_s25, 0 }
  0x24   : > { %s151_s8 = sshll.u32 %s1602_s2, 4  ;;  %s1637_s18 = smov (%p32_p3, %s31_s18), 0  ;;  %s152_s8 = int_to_ptr.hbm [resolvable:$true] %s151_s8 }
  0x25   : > { %836 = dma.hbm_to_vmem [thread:$0]  (!%p834_p2), %s152_s8, 2048, %s154_s10, [#allocation7], %s1573_s11, %s1573_s11, %s1575_s15  }
  0x26   : > { %1603 = sst [smem:[#allocation21_spill]] %s1637_s18  ;;  %s1639_s27 = smov (!%p32_p3, %s34_s27), %s1211_s24 }
  0x27   : > { %s1369_s7 = ssub.s32 %s1207_s23, %s1637_s18  ;;  %p1373_p9 = por %p51_p7, %p50_p5 }
  0x28   : > { %p36_p10 = scmp.ge.s32.totalorder %s1639_s27, 2  ;;  %p67_p11 = scmp.eq.s32.totalorder %s1369_s7, 0 }
  0x29   : > { %s116_s9 = sadd.s32 1, %s1171_s14  ;;  %p849_p0 = scmp.lt.s32.totalorder %s1215_s25, 4 }
  0x2a   : > { %s1641_s27 = smov (%p36_p10, %s1639_s27), 0  ;;  %s167_s10 = sand.u32 1, %s1195_s20  }
  0x2b   : > { %1605 = sst [smem:[#allocation22_spill]] %s1641_s27  ;;  %s724_s11 = sshll.u32 %s1211_s24, 5 }
  0x2c   : > { %s38_s15 = ssub.s32 %s1211_s24, %s1641_s27  ;;  %s705_s18 = sshll.u32 %s167_s10, 7 }
  0x2d   : > { %s40_s2 = sor.u32 %s1369_s7, %s38_s15  ;;  %p114_p2 = scmp.eq.s32.totalorder %s38_s15, 0 }
  0x2e   : > { %p41_p3 = scmp.eq.s32.totalorder %s40_s2, 0  ;;  %s176_s3 = sadd.s32 %s1207_s23, %s724_s11 }
  0x2f   : > { %s1388_s4 = scalar_select %p114_p2, %s1171_s14, %s116_s9  }
  0x30   : > { %s1391_s12 = scalar_select %p41_p3, %s1195_s20, %s43_s6  }
  0x31   : > { %1606 = sst [smem:[#allocation23_spill]] %s1388_s4  ;;  %s708_s30 = sshll.u32 %s176_s3, 3 }
  0x32   : > { %1607 = sst [smem:[#allocation24_spill]] %s1391_s12  ;;  %s171_s22 = scalar_lea.vmem [#allocation3], %s705_s18 }
  0x33   : > { %s181_s27 = sshll.u32 %s171_s22, 4  ;;  %s1608_s0 = sld [smem:[#allocation25_spill]]  ;;  %s182_s27 = int_to_ptr.vmem [resolvable:$true] %s181_s27 }
  0x34   : > { %p838_p5 = pnand %p849_p0, %p1373_p9  ;;  %s168_s6 = scalar_lea.sflag [#allocation4], %s167_s10 }
  0x35   : > { %s1220_s12 = smov 256   ;;  %s1609_s20 = smov 8  }
  0x36   : > { %s1610_s11 = smov 128   ;;  %s191_s3 = sand.u32 1, %s1215_s25  }
  0x37   : > { %s69_s18 = sadd.s32 1, %s1183_s17  ;;  %p76_p10 = scmp.ne.s32.totalorder %s1183_s17, %s1179_s16 }
  0x38   : > { %s1410_s22 = scalar_select %p67_p11, %s1183_s17, %s69_s18  }
  0x39   : > { %s178_s24 = scalar_lea.hbm %s1608_s0, %s708_s30  ;;  %p78_p2 = por %p76_p10, %p51_p7 }
  0x3a   : > { %s179_s9 = sshll.u32 %s178_s24, 4  ;;  %s193_s30 = sand.u32 1, %s1183_s17   ;;  %s180_s9 = int_to_ptr.hbm [resolvable:$true] %s179_s9 }
  0x3b   : > { %840 = dma.hbm_to_vmem [thread:$0]  (!%p838_p5), %s180_s9, 2048, %s182_s27, %s168_s6, %s1220_s12, %s1610_s11, %s1609_s20  }
  0x3c   : > { %s725_s24 = sshll.u32 %s1207_s23, 7  ;;  %s709_s8 = sshll.u32 %s193_s30, 7 }
  0x3d   : > { %s200_s10 = scalar_lea.hbm %s1570_s1, %s725_s24  ;;  %s195_s4 = scalar_lea.vmem [#allocation6], %s709_s8 }
  0x3e   : > { %s201_s0 = sshll.u32 %s200_s10, 4  ;;  %s203_s14 = sshll.u32 %s195_s4, 4  ;;  %s202_s0 = int_to_ptr.hbm [resolvable:$true] %s201_s0  ;;  %s204_s14 = int_to_ptr.vmem [resolvable:$true] %s203_s14 }
  0x3f   : > { %p841_p9 = pnand %p849_p0, %p78_p2  ;;  %s192_s12 = scalar_lea.sflag [#allocation7], %s191_s3 }
  0x40   : > { %215 = sbr.rel (%p1344_p13) target bundleno = 506 (0x1fa), region = 32  ;;  %s217_s27 = sand.u32 (!%p1344_p13), 1, %s1191_s19  }
  0x41   : > { %843 = dma.hbm_to_vmem [thread:$0]  (!%p841_p9), %s202_s0, 2048, %s204_s14, %s192_s12, %s1610_s11, %s1610_s11, %s1609_s20  }
  0x42   : > { %s713_s7 = sshll.u32 (!%p1344_p13), %s217_s27, 7  ;;  %s218_s9 = scalar_lea.sflag (!%p1344_p13), [#allocation4], %s217_s27 }
  0x43   : > { %s1427_s6 = scalar_lea.vmem (!%p1344_p13), [#allocation3], %s713_s7 }
  0x45   : > { %1146 = dma.done.wait (%p1321_p4), %s218_s9, 2048  }
  0x46   : > { %1148 = vsyncadd (%p1321_p4), %s218_s9, 4294965248  ;;  %s227_s4 = sand.u32 1, %s1311_s26   ;;  %s229_s0 = sand.u32 1, %s1179_s16  }
  0x47   : > { %s714_s14 = sshll.u32 %s229_s0, 7  ;;  %s228_s20 = scalar_lea.sflag [#allocation7], %s227_s4 }
  0x48   : > { %s1435_s5 = scalar_lea.vmem [#allocation6], %s714_s14 }
  0x49   : > { %1150 = dma.done.wait (%p1328_p6), %s228_s20, 2048  }
  0x4a   : > { %1152 = vsyncadd (%p1328_p6), %s228_s20, 4294965248 }
  0x4b   : > { %1154 = dma.done.wait (%p57_p1), [#allocation7], 2048  }
  0x4c   : > { %1156 = vsyncadd (%p57_p1), [#allocation7], 4294965248  ;;  %s262_s28 = sand.u32 1, %s1167_s13   ;;  %p717_p4 = scmp.ne.s32.totalorder %s1199_s21, 0 }
  0x4d   : > { %s716_s11 = sshll.u32 %s262_s28, 7 }
  0x4e   : > { %s1448_s3 = scalar_lea.vmem [#allocation9], %s716_s11  ;;  %271 = sbr.rel (%p717_p4) target bundleno = 100 (0x64), region = 48 }
  0x53   : > { %v1221_v0 = vmov 0.0  }
  0x54   : > { %272 = vst [vmem:[#allocation2 + $0x30] sm:$0xff] %v1221_v0 }
  0x55   : > { %273 = vst [vmem:[#allocation2] sm:$0xff] %v1221_v0 }
  0x56   : > { %274 = vst [vmem:[#allocation2 + $0x58] sm:$0xff] %v1221_v0 }
  0x57   : > { %275 = vst [vmem:[#allocation2 + $0x18] sm:$0xff] %v1221_v0 }
  0x58   : > { %276 = vst [vmem:[#allocation2 + $0x50] sm:$0xff] %v1221_v0 }
  0x59   : > { %277 = vst [vmem:[#allocation2 + $0x68] sm:$0xff] %v1221_v0 }
  0x5a   : > { %278 = vst [vmem:[#allocation2 + $0x8] sm:$0xff] %v1221_v0 }
  0x5b   : > { %279 = vst [vmem:[#allocation2 + $0x48] sm:$0xff] %v1221_v0 }
  0x5c   : > { %280 = vst [vmem:[#allocation2 + $0x40] sm:$0xff] %v1221_v0 }
  0x5d   : > { %281 = vst [vmem:[#allocation2 + $0x20] sm:$0xff] %v1221_v0 }
  0x5e   : > { %282 = vst [vmem:[#allocation2 + $0x10] sm:$0xff] %v1221_v0 }
  0x5f   : > { %283 = vst [vmem:[#allocation2 + $0x38] sm:$0xff] %v1221_v0 }
  0x60   : > { %284 = vst [vmem:[#allocation2 + $0x60] sm:$0xff] %v1221_v0 }
  0x61   : > { %285 = vst [vmem:[#allocation2 + $0x70] sm:$0xff] %v1221_v0 }
  0x62   : > { %286 = vst [vmem:[#allocation2 + $0x78] sm:$0xff] %v1221_v0 }
  0x63   : > { %287 = vst [vmem:[#allocation2 + $0x28] sm:$0xff] %v1221_v0 }
  0x64 PF: > { %v335_v1 = vld [vmem:[%s1435_s5 + $0x78] sm:$0xff]  ;;  %v334_v2 = vld [vmem:[%s1435_s5 + $0x70] sm:$0xff]  ;;  %v333_v3 = vld [vmem:[%s1435_s5 + $0x68] sm:$0xff]  ;;  %p718_p1 = scmp.ne.s32.totalorder %s1199_s21, 1 }
  0x65   : > { %728 = vmatpush.msra.mxu2 %v335_v1  ;;  %729 = vmatpush.msra.mxu3 %v335_v1  ;;  %v332_v4 = vld [vmem:[%s1435_s5 + $0x60] sm:$0xff]  ;;  %v331_v5 = vld [vmem:[%s1435_s5 + $0x58] sm:$0xff]  ;;  %v330_v6 = vld [vmem:[%s1435_s5 + $0x50] sm:$0xff] }
  0x66   : > { %336 = vmatpush.msra.mxu0 %v335_v1  ;;  %727 = vmatpush.msra.mxu1 %v335_v1  ;;  %v329_v7 = vld [vmem:[%s1435_s5 + $0x48] sm:$0xff]  ;;  %v328_v8 = vld [vmem:[%s1435_s5 + $0x40] sm:$0xff]  ;;  %v327_v9 = vld [vmem:[%s1435_s5 + $0x38] sm:$0xff] }
  0x67   : > { %731 = vmatpush.msra.mxu2 %v334_v2  ;;  %732 = vmatpush.msra.mxu3 %v334_v2  ;;  %v326_v10 = vld [vmem:[%s1435_s5 + $0x30] sm:$0xff]  ;;  %v325_v11 = vld [vmem:[%s1435_s5 + $0x28] sm:$0xff]  ;;  %v324_v12 = vld [vmem:[%s1435_s5 + $0x20] sm:$0xff] }
  0x68   : > { %337 = vmatpush.msra.mxu0 %v334_v2  ;;  %730 = vmatpush.msra.mxu1 %v334_v2  ;;  %v323_v13 = vld [vmem:[%s1435_s5 + $0x18] sm:$0xff]  ;;  %v322_v14 = vld [vmem:[%s1435_s5 + $0x10] sm:$0xff]  ;;  %v321_v15 = vld [vmem:[%s1435_s5 + $0x8] sm:$0xff] }
  0x69   : > { %734 = vmatpush.msra.mxu2 %v333_v3  ;;  %735 = vmatpush.msra.mxu3 %v333_v3  ;;  %v320_v16 = vld [vmem:[%s1435_s5] sm:$0xff]  ;;  %v313_v21 = vld [vmem:[%s1427_s6 + $0x48] sm:$0xff]  ;;  %v314_v25 = vld [vmem:[%s1427_s6 + $0x50] sm:$0xff] }
  0x6a   : > { %338 = vmatpush.msra.mxu0 %v333_v3  ;;  %733 = vmatpush.msra.mxu1 %v333_v3  ;;  %v312_v17 = vld [vmem:[%s1427_s6 + $0x40] sm:$0xff]  ;;  %v317_v22 = vld [vmem:[%s1427_s6 + $0x68] sm:$0xff]  ;;  %v318_v26 = vld [vmem:[%s1427_s6 + $0x70] sm:$0xff] }
  0x6b   : > { %737 = vmatpush.msra.mxu2 %v332_v4  ;;  %738 = vmatpush.msra.mxu3 %v332_v4  ;;  %v316_v18 = vld [vmem:[%s1427_s6 + $0x60] sm:$0xff]  ;;  %v305_v23 = vld [vmem:[%s1427_s6 + $0x8] sm:$0xff]  ;;  %v306_v27 = vld [vmem:[%s1427_s6 + $0x10] sm:$0xff] }
  0x6c   : > { %339 = vmatpush.msra.mxu0 %v332_v4  ;;  %736 = vmatpush.msra.mxu1 %v332_v4  ;;  %v304_v19 = vld [vmem:[%s1427_s6] sm:$0xff]  ;;  %v309_v24 = vld [vmem:[%s1427_s6 + $0x28] sm:$0xff]  ;;  %v310_v28 = vld [vmem:[%s1427_s6 + $0x30] sm:$0xff] }
  0x6d   : > { %740 = vmatpush.msra.mxu2 %v331_v5  ;;  %741 = vmatpush.msra.mxu3 %v331_v5  ;;  %v308_v20 = vld [vmem:[%s1427_s6 + $0x20] sm:$0xff]  ;;  %v315_v29 = vld [vmem:[%s1427_s6 + $0x58] sm:$0xff]  ;;  %v288_v33 = vld [vmem:[#allocation2 + $0x30] sm:$0xff] }
  0x6e   : > { %340 = vmatpush.msra.mxu0 %v331_v5  ;;  %739 = vmatpush.msra.mxu1 %v331_v5  ;;  %v319_v30 = vld [vmem:[%s1427_s6 + $0x78] sm:$0xff]  ;;  %v292_v34 = vld [vmem:[#allocation2 + $0x50] sm:$0xff]  ;;  %v296_v39 = vld [vmem:[#allocation2 + $0x40] sm:$0xff] }
  0x6f   : > { %743 = vmatpush.msra.mxu2 %v330_v6  ;;  %744 = vmatpush.msra.mxu3 %v330_v6  ;;  %v307_v31 = vld [vmem:[%s1427_s6 + $0x18] sm:$0xff]  ;;  %v300_v40 = vld [vmem:[#allocation2 + $0x60] sm:$0xff]  ;;  %v293_v46 = vld [vmem:[#allocation2 + $0x68] sm:$0xff] }
  0x70   : > { %341 = vmatpush.msra.mxu0 %v330_v6  ;;  %742 = vmatpush.msra.mxu1 %v330_v6  ;;  %v311_v32 = vld [vmem:[%s1427_s6 + $0x38] sm:$0xff]  ;;  %v289_v45 = vld [vmem:[#allocation2] sm:$0xff]  ;;  %v301_v52 = vld [vmem:[#allocation2 + $0x70] sm:$0xff] }
  0x71   : > { %746 = vmatpush.msra.mxu2 %v329_v7  ;;  %747 = vmatpush.msra.mxu3 %v329_v7  ;;  %v297_v51 = vld [vmem:[#allocation2 + $0x20] sm:$0xff]  ;;  %v290_v57 = vld [vmem:[#allocation2 + $0x58] sm:$0xff]  ;;  %v294_v58 = vld [vmem:[#allocation2 + $0x8] sm:$0xff] }
  0x72   : > { %342 = vmatpush.msra.mxu0 %v329_v7  ;;  %745 = vmatpush.msra.mxu1 %v329_v7  ;;  %v298_v63 = vld [vmem:[#allocation2 + $0x10] sm:$0xff]  ;;  %v302_v0 = vld [vmem:[#allocation2 + $0x78] sm:$0xff]  ;;  %v295_v6 = vld [vmem:[#allocation2 + $0x48] sm:$0xff] }
  0x73   : > { %749 = vmatpush.msra.mxu2 %v328_v8  ;;  %750 = vmatpush.msra.mxu3 %v328_v8  ;;  %v291_v5 = vld [vmem:[#allocation2 + $0x18] sm:$0xff] }
  0x74   : > { %343 = vmatpush.msra.mxu0 %v328_v8  ;;  %748 = vmatpush.msra.mxu1 %v328_v8 }
  0x75   : > { %752 = vmatpush.msra.mxu2 %v327_v9  ;;  %753 = vmatpush.msra.mxu3 %v327_v9 }
  0x76   : > { %344 = vmatpush.msra.mxu0 %v327_v9  ;;  %751 = vmatpush.msra.mxu1 %v327_v9 }
  0x77   : > { %755 = vmatpush.msra.mxu2 %v326_v10  ;;  %756 = vmatpush.msra.mxu3 %v326_v10 }
  0x78   : > { %345 = vmatpush.msra.mxu0 %v326_v10  ;;  %754 = vmatpush.msra.mxu1 %v326_v10 }
  0x79   : > { %758 = vmatpush.msra.mxu2 %v325_v11  ;;  %759 = vmatpush.msra.mxu3 %v325_v11 }
  0x7a   : > { %346 = vmatpush.msra.mxu0 %v325_v11  ;;  %757 = vmatpush.msra.mxu1 %v325_v11  ;;  %v299_v11 = vld [vmem:[#allocation2 + $0x38] sm:$0xff] }
  0x7b   : > { %761 = vmatpush.msra.mxu2 %v324_v12  ;;  %762 = vmatpush.msra.mxu3 %v324_v12 }
  0x7c   : > { %347 = vmatpush.msra.mxu0 %v324_v12  ;;  %760 = vmatpush.msra.mxu1 %v324_v12  ;;  %v303_v12 = vld [vmem:[#allocation2 + $0x28] sm:$0xff] }
  0x7d   : > { %764 = vmatpush.msra.mxu2 %v323_v13  ;;  %765 = vmatpush.msra.mxu3 %v323_v13 }
  0x7e   : > { %348 = vmatpush.msra.mxu0 %v323_v13  ;;  %763 = vmatpush.msra.mxu1 %v323_v13 }
  0x7f   : > { %767 = vmatpush.msra.mxu2 %v322_v14  ;;  %768 = vmatpush.msra.mxu3 %v322_v14 }
  0x80   : > { %349 = vmatpush.msra.mxu0 %v322_v14  ;;  %766 = vmatpush.msra.mxu1 %v322_v14 }
  0x81   : > { %770 = vmatpush.msra.mxu2 %v321_v15  ;;  %771 = vmatpush.msra.mxu3 %v321_v15 }
  0x82   : > { %350 = vmatpush.msra.mxu0 %v321_v15  ;;  %769 = vmatpush.msra.mxu1 %v321_v15 }
  0x83   : > { %773 = vmatpush.msra.mxu2 %v320_v16  ;;  %774 = vmatpush.msra.mxu3 %v320_v16 }
  0x84   : > { %376 = vmatmul.f32.vlgmr.msra.gmra.mxu2 %v312_v17  ;;  %388 = vmatmul.f32.vlgmr.msra.gmra.mxu3 %v316_v18 }
  0x85   : > { %351 = vmatpush.msra.mxu0 %v320_v16  ;;  %772 = vmatpush.msra.mxu1 %v320_v16 }
  0x86   : > { %352 = vmatmul.f32.vlgmr.msra.gmra.mxu0 %v304_v19  ;;  %364 = vmatmul.f32.vlgmr.msra.gmra.mxu1 %v308_v20 }
  0x8c   : > { %379 = vmatmul.f32.gmra.mxu2 %v313_v21  ;;  %391 = vmatmul.f32.gmra.mxu3 %v317_v22 }
  0x8e   : > { %355 = vmatmul.f32.gmra.mxu0 %v305_v23  ;;  %367 = vmatmul.f32.gmra.mxu1 %v309_v24 }
  0x94   : > { %382 = vmatmul.f32.gmra.mxu2 %v314_v25  ;;  %394 = vmatmul.f32.gmra.mxu3 %v318_v26 }
  0x96   : > { %358 = vmatmul.f32.gmra.mxu0 %v306_v27  ;;  %370 = vmatmul.f32.gmra.mxu1 %v310_v28 }
  0x9c   : > { %385 = vmatmul.f32.gmra.mxu2 %v315_v29  ;;  %397 = vmatmul.f32.gmra.mxu3 %v319_v30 }
  0x9e   : > { %361 = vmatmul.f32.gmra.mxu0 %v307_v31  ;;  %373 = vmatmul.f32.gmra.mxu1 %v311_v32 }
 0x103   : > { %v353_v35 = vpop.f32.mrf.mxu0  ;;  %v365_v36 = vpop.f32.mrf.mxu1 }
 0x104   : > { %v401_v37 = vadd.f32 %v353_v35, %v288_v33  ;;  %v405_v38 = vadd.f32 %v365_v36, %v292_v34 }
 0x106   : > { %417 = vst [vmem:[#allocation2 + $0x30] sm:$0xff] %v401_v37 }
 0x107   : > { %421 = vst [vmem:[#allocation2 + $0x50] sm:$0xff] %v405_v38  ;;  %v377_v41 = vpop.f32.mrf.mxu2  ;;  %v389_v42 = vpop.f32.mrf.mxu3 }
 0x108   : > { %v409_v43 = vadd.f32 %v377_v41, %v296_v39  ;;  %v413_v44 = vadd.f32 %v389_v42, %v300_v40 }
 0x10a   : > { %425 = vst [vmem:[#allocation2 + $0x40] sm:$0xff] %v409_v43 }
 0x10b   : > { %429 = vst [vmem:[#allocation2 + $0x60] sm:$0xff] %v413_v44  ;;  %v356_v47 = vpop.f32.mrf.mxu0  ;;  %v368_v48 = vpop.f32.mrf.mxu1 }
 0x10c   : > { %v402_v49 = vadd.f32 %v356_v47, %v289_v45  ;;  %v406_v50 = vadd.f32 %v368_v48, %v293_v46 }
 0x10e   : > { %418 = vst [vmem:[#allocation2] sm:$0xff] %v402_v49 }
 0x10f   : > { %422 = vst [vmem:[#allocation2 + $0x68] sm:$0xff] %v406_v50  ;;  %v380_v53 = vpop.f32.mrf.mxu2  ;;  %v392_v54 = vpop.f32.mrf.mxu3 }
 0x110   : > { %v410_v55 = vadd.f32 %v380_v53, %v297_v51  ;;  %v414_v56 = vadd.f32 %v392_v54, %v301_v52 }
 0x112   : > { %426 = vst [vmem:[#allocation2 + $0x20] sm:$0xff] %v410_v55 }
 0x113   : > { %430 = vst [vmem:[#allocation2 + $0x70] sm:$0xff] %v414_v56  ;;  %v359_v59 = vpop.f32.mrf.mxu0  ;;  %v371_v60 = vpop.f32.mrf.mxu1 }
 0x114   : > { %v403_v61 = vadd.f32 %v359_v59, %v290_v57  ;;  %v407_v62 = vadd.f32 %v371_v60, %v294_v58 }
 0x116   : > { %419 = vst [vmem:[#allocation2 + $0x58] sm:$0xff] %v403_v61 }
 0x117   : > { %423 = vst [vmem:[#allocation2 + $0x8] sm:$0xff] %v407_v62  ;;  %v383_v1 = vpop.f32.mrf.mxu2  ;;  %v395_v2 = vpop.f32.mrf.mxu3 }
 0x118   : > { %v411_v3 = vadd.f32 %v383_v1, %v298_v63  ;;  %v415_v4 = vadd.f32 %v395_v2, %v302_v0 }
 0x11a   : > { %427 = vst [vmem:[#allocation2 + $0x10] sm:$0xff] %v411_v3 }
 0x11b   : > { %431 = vst [vmem:[#allocation2 + $0x78] sm:$0xff] %v415_v4  ;;  %v362_v7 = vpop.f32.mrf.mxu0  ;;  %v374_v8 = vpop.f32.mrf.mxu1 }
 0x11c   : > { %v404_v9 = vadd.f32 %v362_v7, %v291_v5  ;;  %v408_v10 = vadd.f32 %v374_v8, %v295_v6 }
 0x11e   : > { %420 = vst [vmem:[#allocation2 + $0x18] sm:$0xff] %v404_v9 }
 0x11f   : > { %424 = vst [vmem:[#allocation2 + $0x48] sm:$0xff] %v408_v10  ;;  %v386_v13 = vpop.f32.mrf.mxu2  ;;  %v398_v14 = vpop.f32.mrf.mxu3  ;;  %436 = sbr.rel (%p718_p1) target bundleno = 484 (0x1e4), region = 52 }
 0x120   : > { %v412_v15 = vadd.f32 %v386_v13, %v299_v11  ;;  %v416_v16 = vadd.f32 %v398_v14, %v303_v12 }
 0x122   : > { %428 = vst [vmem:[#allocation2 + $0x38] sm:$0xff] %v412_v15 }
 0x123   : > { %432 = vst [vmem:[#allocation2 + $0x28] sm:$0xff] %v416_v16 }
 0x124   : > { %v468_v17 = vld [vmem:[#allocation8 + $0x78] sm:$0xff]  ;;  %v467_v18 = vld [vmem:[#allocation8 + $0x70] sm:$0xff]  ;;  %v466_v19 = vld [vmem:[#allocation8 + $0x68] sm:$0xff] }
 0x125   : > { %776 = vmatpush.msra.mxu2 %v468_v17  ;;  %777 = vmatpush.msra.mxu3 %v468_v17  ;;  %v465_v20 = vld [vmem:[#allocation8 + $0x60] sm:$0xff]  ;;  %v464_v21 = vld [vmem:[#allocation8 + $0x58] sm:$0xff]  ;;  %v463_v22 = vld [vmem:[#allocation8 + $0x50] sm:$0xff] }
 0x126   : > { %469 = vmatpush.msra.mxu0 %v468_v17  ;;  %775 = vmatpush.msra.mxu1 %v468_v17  ;;  %v462_v23 = vld [vmem:[#allocation8 + $0x48] sm:$0xff]  ;;  %v461_v24 = vld [vmem:[#allocation8 + $0x40] sm:$0xff]  ;;  %v460_v25 = vld [vmem:[#allocation8 + $0x38] sm:$0xff] }
 0x127   : > { %779 = vmatpush.msra.mxu2 %v467_v18  ;;  %780 = vmatpush.msra.mxu3 %v467_v18  ;;  %v459_v26 = vld [vmem:[#allocation8 + $0x30] sm:$0xff]  ;;  %v458_v27 = vld [vmem:[#allocation8 + $0x28] sm:$0xff]  ;;  %v457_v28 = vld [vmem:[#allocation8 + $0x20] sm:$0xff] }
 0x128   : > { %470 = vmatpush.msra.mxu0 %v467_v18  ;;  %778 = vmatpush.msra.mxu1 %v467_v18  ;;  %v456_v29 = vld [vmem:[#allocation8 + $0x18] sm:$0xff]  ;;  %v455_v30 = vld [vmem:[#allocation8 + $0x10] sm:$0xff]  ;;  %v454_v31 = vld [vmem:[#allocation8 + $0x8] sm:$0xff] }
 0x129   : > { %782 = vmatpush.msra.mxu2 %v466_v19  ;;  %783 = vmatpush.msra.mxu3 %v466_v19  ;;  %v453_v32 = vld [vmem:[#allocation8] sm:$0xff]  ;;  %v437_v35 = vld [vmem:[#allocation2 + $0x30] sm:$0xff]  ;;  %v442_v40 = vld [vmem:[#allocation2 + $0x68] sm:$0xff] }
 0x12a   : > { %471 = vmatpush.msra.mxu0 %v466_v19  ;;  %781 = vmatpush.msra.mxu1 %v466_v19  ;;  %v445_v33 = vld [vmem:[#allocation2 + $0x40] sm:$0xff]  ;;  %v441_v36 = vld [vmem:[#allocation2 + $0x50] sm:$0xff]  ;;  %v451_v42 = vld [vmem:[#allocation2 + $0x78] sm:$0xff] }
 0x12b   : > { %785 = vmatpush.msra.mxu2 %v465_v20  ;;  %786 = vmatpush.msra.mxu3 %v465_v20  ;;  %v449_v34 = vld [vmem:[#allocation2 + $0x60] sm:$0xff]  ;;  %v450_v38 = vld [vmem:[#allocation2 + $0x70] sm:$0xff]  ;;  %v439_v43 = vld [vmem:[#allocation2 + $0x58] sm:$0xff] }
 0x12c   : > { %472 = vmatpush.msra.mxu0 %v465_v20  ;;  %784 = vmatpush.msra.mxu1 %v465_v20  ;;  %v446_v37 = vld [vmem:[#allocation2 + $0x20] sm:$0xff]  ;;  %v447_v41 = vld [vmem:[#allocation2 + $0x10] sm:$0xff]  ;;  %v443_v44 = vld [vmem:[#allocation2 + $0x8] sm:$0xff] }
 0x12d   : > { %788 = vmatpush.msra.mxu2 %v464_v21  ;;  %789 = vmatpush.msra.mxu3 %v464_v21  ;;  %v438_v39 = vld [vmem:[#allocation2] sm:$0xff]  ;;  %v448_v45 = vld [vmem:[#allocation2 + $0x38] sm:$0xff]  ;;  %v452_v46 = vld [vmem:[#allocation2 + $0x28] sm:$0xff] }
 0x12e   : > { %473 = vmatpush.msra.mxu0 %v464_v21  ;;  %787 = vmatpush.msra.mxu1 %v464_v21  ;;  %v440_v47 = vld [vmem:[#allocation2 + $0x18] sm:$0xff]  ;;  %v444_v48 = vld [vmem:[#allocation2 + $0x48] sm:$0xff] }
 0x12f   : > { %791 = vmatpush.msra.mxu2 %v463_v22  ;;  %792 = vmatpush.msra.mxu3 %v463_v22 }
 0x130   : > { %474 = vmatpush.msra.mxu0 %v463_v22  ;;  %790 = vmatpush.msra.mxu1 %v463_v22 }
 0x131   : > { %794 = vmatpush.msra.mxu2 %v462_v23  ;;  %795 = vmatpush.msra.mxu3 %v462_v23 }
 0x132   : > { %475 = vmatpush.msra.mxu0 %v462_v23  ;;  %793 = vmatpush.msra.mxu1 %v462_v23 }
 0x133   : > { %797 = vmatpush.msra.mxu2 %v461_v24  ;;  %798 = vmatpush.msra.mxu3 %v461_v24 }
 0x134   : > { %476 = vmatpush.msra.mxu0 %v461_v24  ;;  %796 = vmatpush.msra.mxu1 %v461_v24 }
 0x135   : > { %800 = vmatpush.msra.mxu2 %v460_v25  ;;  %801 = vmatpush.msra.mxu3 %v460_v25 }
 0x136   : > { %477 = vmatpush.msra.mxu0 %v460_v25  ;;  %799 = vmatpush.msra.mxu1 %v460_v25 }
 0x137   : > { %803 = vmatpush.msra.mxu2 %v459_v26  ;;  %804 = vmatpush.msra.mxu3 %v459_v26 }
 0x138   : > { %478 = vmatpush.msra.mxu0 %v459_v26  ;;  %802 = vmatpush.msra.mxu1 %v459_v26 }
 0x139   : > { %806 = vmatpush.msra.mxu2 %v458_v27  ;;  %807 = vmatpush.msra.mxu3 %v458_v27 }
 0x13a   : > { %479 = vmatpush.msra.mxu0 %v458_v27  ;;  %805 = vmatpush.msra.mxu1 %v458_v27 }
 0x13b   : > { %809 = vmatpush.msra.mxu2 %v457_v28  ;;  %810 = vmatpush.msra.mxu3 %v457_v28 }
 0x13c   : > { %480 = vmatpush.msra.mxu0 %v457_v28  ;;  %808 = vmatpush.msra.mxu1 %v457_v28 }
 0x13d   : > { %812 = vmatpush.msra.mxu2 %v456_v29  ;;  %813 = vmatpush.msra.mxu3 %v456_v29 }
 0x13e   : > { %481 = vmatpush.msra.mxu0 %v456_v29  ;;  %811 = vmatpush.msra.mxu1 %v456_v29 }
 0x13f   : > { %815 = vmatpush.msra.mxu2 %v455_v30  ;;  %816 = vmatpush.msra.mxu3 %v455_v30 }
 0x140   : > { %482 = vmatpush.msra.mxu0 %v455_v30  ;;  %814 = vmatpush.msra.mxu1 %v455_v30 }
 0x141   : > { %818 = vmatpush.msra.mxu2 %v454_v31  ;;  %819 = vmatpush.msra.mxu3 %v454_v31 }
 0x142   : > { %483 = vmatpush.msra.mxu0 %v454_v31  ;;  %817 = vmatpush.msra.mxu1 %v454_v31 }
 0x143   : > { %821 = vmatpush.msra.mxu2 %v453_v32  ;;  %822 = vmatpush.msra.mxu3 %v453_v32 }
 0x144   : > { %509 = vmatmul.f32.vlgmr.msra.gmra.mxu2 %v445_v33  ;;  %521 = vmatmul.f32.vlgmr.msra.gmra.mxu3 %v449_v34 }
 0x145   : > { %484 = vmatpush.msra.mxu0 %v453_v32  ;;  %820 = vmatpush.msra.mxu1 %v453_v32 }
 0x146   : > { %485 = vmatmul.f32.vlgmr.msra.gmra.mxu0 %v437_v35  ;;  %497 = vmatmul.f32.vlgmr.msra.gmra.mxu1 %v441_v36 }
 0x14c   : > { %512 = vmatmul.f32.gmra.mxu2 %v446_v37  ;;  %524 = vmatmul.f32.gmra.mxu3 %v450_v38 }
 0x14e   : > { %488 = vmatmul.f32.gmra.mxu0 %v438_v39  ;;  %500 = vmatmul.f32.gmra.mxu1 %v442_v40 }
 0x154   : > { %515 = vmatmul.f32.gmra.mxu2 %v447_v41  ;;  %527 = vmatmul.f32.gmra.mxu3 %v451_v42 }
 0x156   : > { %491 = vmatmul.f32.gmra.mxu0 %v439_v43  ;;  %503 = vmatmul.f32.gmra.mxu1 %v443_v44 }
 0x15c   : > { %518 = vmatmul.f32.gmra.mxu2 %v448_v45  ;;  %530 = vmatmul.f32.gmra.mxu3 %v452_v46 }
 0x15e   : > { %494 = vmatmul.f32.gmra.mxu0 %v440_v47  ;;  %506 = vmatmul.f32.gmra.mxu1 %v444_v48 }
 0x1c3   : > { %v486_v49 = vpop.f32.mrf.mxu0  ;;  %v498_v50 = vpop.f32.mrf.mxu1 }
 0x1c4   : > { %v534_v51 = vmax.f32 %v486_v49, 0.0  ;;  %v538_v52 = vmax.f32 %v498_v50, 0.0 }
 0x1c6   : > { %550 = vst [vmem:[%s1448_s3] sm:$0xff] %v534_v51 }
 0x1c7   : > { %554 = vst [vmem:[%s1448_s3 + $0x20] sm:$0xff] %v538_v52  ;;  %v510_v53 = vpop.f32.mrf.mxu2  ;;  %v522_v54 = vpop.f32.mrf.mxu3 }
 0x1c8   : > { %v542_v55 = vmax.f32 %v510_v53, 0.0  ;;  %v546_v56 = vmax.f32 %v522_v54, 0.0 }
 0x1ca   : > { %558 = vst [vmem:[%s1448_s3 + $0x40] sm:$0xff] %v542_v55 }
 0x1cb   : > { %562 = vst [vmem:[%s1448_s3 + $0x60] sm:$0xff] %v546_v56  ;;  %v489_v57 = vpop.f32.mrf.mxu0  ;;  %v501_v58 = vpop.f32.mrf.mxu1 }
 0x1cc   : > { %v535_v59 = vmax.f32 %v489_v57, 0.0  ;;  %v539_v60 = vmax.f32 %v501_v58, 0.0 }
 0x1ce   : > { %551 = vst [vmem:[%s1448_s3 + $0x8] sm:$0xff] %v535_v59 }
 0x1cf   : > { %555 = vst [vmem:[%s1448_s3 + $0x28] sm:$0xff] %v539_v60  ;;  %v513_v61 = vpop.f32.mrf.mxu2  ;;  %v525_v62 = vpop.f32.mrf.mxu3 }
 0x1d0   : > { %v543_v63 = vmax.f32 %v513_v61, 0.0  ;;  %v547_v0 = vmax.f32 %v525_v62, 0.0 }
 0x1d2   : > { %559 = vst [vmem:[%s1448_s3 + $0x48] sm:$0xff] %v543_v63 }
 0x1d3   : > { %563 = vst [vmem:[%s1448_s3 + $0x68] sm:$0xff] %v547_v0  ;;  %v492_v1 = vpop.f32.mrf.mxu0  ;;  %v504_v2 = vpop.f32.mrf.mxu1 }
 0x1d4   : > { %v536_v3 = vmax.f32 %v492_v1, 0.0  ;;  %v540_v4 = vmax.f32 %v504_v2, 0.0 }
 0x1d6   : > { %552 = vst [vmem:[%s1448_s3 + $0x10] sm:$0xff] %v536_v3 }
 0x1d7   : > { %556 = vst [vmem:[%s1448_s3 + $0x30] sm:$0xff] %v540_v4  ;;  %v516_v5 = vpop.f32.mrf.mxu2  ;;  %v528_v6 = vpop.f32.mrf.mxu3 }
 0x1d8   : > { %v544_v7 = vmax.f32 %v516_v5, 0.0  ;;  %v548_v8 = vmax.f32 %v528_v6, 0.0 }
 0x1da   : > { %560 = vst [vmem:[%s1448_s3 + $0x50] sm:$0xff] %v544_v7 }
 0x1db   : > { %564 = vst [vmem:[%s1448_s3 + $0x70] sm:$0xff] %v548_v8  ;;  %v495_v9 = vpop.f32.mrf.mxu0  ;;  %v507_v10 = vpop.f32.mrf.mxu1 }
 0x1dc   : > { %v537_v11 = vmax.f32 %v495_v9, 0.0  ;;  %v541_v12 = vmax.f32 %v507_v10, 0.0 }
 0x1de   : > { %553 = vst [vmem:[%s1448_s3 + $0x18] sm:$0xff] %v537_v11 }
 0x1df   : > { %557 = vst [vmem:[%s1448_s3 + $0x38] sm:$0xff] %v541_v12  ;;  %v519_v13 = vpop.f32.mrf.mxu2  ;;  %v531_v14 = vpop.f32.mrf.mxu3 }
 0x1e0   : > { %v545_v15 = vmax.f32 %v519_v13, 0.0  ;;  %v549_v16 = vmax.f32 %v531_v14, 0.0 }
 0x1e2   : > { %561 = vst [vmem:[%s1448_s3 + $0x58] sm:$0xff] %v545_v15 }
 0x1e3   : > { %565 = vst [vmem:[%s1448_s3 + $0x78] sm:$0xff] %v549_v16 }
 0x1e4 PF: > { %s1611_s21 = sld [smem:[#allocation17_spill]]  ;;  %s579_s2 = sshll.u32 %s1448_s3, 4  ;;  %s580_s2 = int_to_ptr.vmem [resolvable:$true] %s579_s2 }
 0x1e5   : > { %s1613_s24 = sld [smem:[#allocation27_spill]]  ;;  %s567_s12 = scalar_lea.sflag [#allocation5], %s262_s28 }
 0x1ea   : > { %s726_s29 = sshll.u32 %s1611_s21, 7 }
 0x1eb   : > { %s1614_s8 = smov %s1613_s24  ;;  %s578_s15 = scalar_lea.hbm %s1613_s24, %s726_s29 }
 0x1ec   : > { %s581_s10 = sshll.u32 %s578_s15, 4  ;;  %s1081_s4 = scalar_lea.hbm %s1614_s8, 256  ;;  %s582_s10 = int_to_ptr.hbm [resolvable:$true] %s581_s10 }
 0x1ed   : > { %s1075_s27 = sshra.s32 %s582_s10, 4  ;;  %s1076_s27 = int_to_ptr.hbm [resolvable:$true] %s1075_s27 }
 0x1ee   : > { %s1077_s7 = scalar_lea.hbm %s1076_s27, 128  ;;  %p1082_p11 = scmp.lt.s32.totalorder %s1076_s27, %s1614_s8 }
 0x1ef   : > { %p1078_p6 = scmp.ne.s32.totalorder %s1076_s27, %s1077_s7  ;;  %p1083_p0 = scmp.lt.s32.totalorder %s1081_s4, %s1077_s7 }
 0x1f1   : > { %p1079_p13 = pnand %p1078_p6, %p1334_p8  ;;  %p1084_p3 = por %p1083_p0, %p1082_p11 }
 0x1f3   : > { %p1080_p7 = pneg %p1079_p13 }
 0x1f5   : > { %p1085_p5 = pnand %p1084_p3, %p1080_p7 }
 0x1f7   : > { %1088 = shalt.err (!%p1085_p5)
}
 0x1f8   : > { %s1222_s20 = smov 128   ;;  %s1223_s5 = smov 8  }
 0x1f9   : > { %831 = dma.vmem_to_hbm [thread:$0]  (%p1334_p8), %s580_s2, 2048, %s582_s10, %s567_s12, %s1222_s20, %s1222_s20, %s1223_s5  }
 0x1fa PF: > { %s1615_s28 = sld [smem:[#allocation14_spill]]  ;;  %p851_p10 = scmp.ge.s32.totalorder %s1215_s25, 2 }
 0x1fc   : > { %p845_p2 = pnand %p851_p10, %p1340_p12 }
 0x1fe   : > { %p846_p9 = pneg %p845_p2 }
 0x200   : > { %s596_s3 = sand.u32 1, %s1615_s28  }
 0x201   : > { %s597_s21 = scalar_lea.sflag [#allocation5], %s596_s3 }
 0x202   : > { %1158 = dma.done.wait (%p846_p9), %s597_s21, 2048  }
 0x203   : > { %1160 = vsyncadd (%p846_p9), %s597_s21, 4294965248  ;;  %s22_s25 = sadd.s32 1, %s1215_s25   ;;  %s1618_s26 = sld [smem:[#allocation15_spill]] }
 0x204   : > { %p1522_p4 = scmp.ge.s32.totalorder %s22_s25, 6   ;;  %s1619_s14 = sld [smem:[#allocation23_spill]] }
 0x205   : > { %s1620_s30 = sld [smem:[#allocation16_spill]]  ;;  %s1625_s12 = smov %s1167_s13 }
 0x206   : > { %s1621_s20 = sld [smem:[#allocation24_spill]]  ;;  %s1627_s15 = smov %s1179_s16 }
 0x207   : > { %s1622_s24 = sld [smem:[#allocation18_spill]]  ;;  %s1628_s16 = smov %s1183_s17 }
 0x208   : > { %s1623_s2 = sld [smem:[#allocation21_spill]]  ;;  %s1629_s17 = smov %s1410_s22 }
 0x209   : > { %s1624_s10 = sld [smem:[#allocation22_spill]]  ;;  %s1626_s13 = smov %s1618_s26 }
 0x20a   : > { %s1630_s18 = smov %s1191_s19  ;;  %s1632_s21 = smov %s1207_s23 }
 0x20b   : > { %s1631_s19 = smov %s1620_s30  ;;  %21 = sbr.rel (!%p1522_p4) target bundleno = 16 (0x10), region = 102 }
 0x20d   : > { %s1633_s22 = smov %s1622_s24 }
 0x20e   : > { %s1634_s23 = smov %s1623_s2 }
 0x20f   : > { %s1635_s24 = smov %s1624_s10 }
 0x210   :  { %603 = vsyncpa [#allocation4], 1 }
 0x211   :  { %605 = vsyncpa [#allocation4 + $0x1], 1 }
 0x212   :  { %606 = vsyncpa [#allocation7], 1 }
 0x213   :  { %608 = vsyncpa [#allocation7 + $0x1], 1 }
 0x214   :  { %609 = vsyncpa [#allocation5], 1 }
 0x215   :  { %611 = vsyncpa [#allocation5 + $0x1], 1 }

</bundles_post_ra>
